<compile_context>
chip_gen: v6e
topology: v6e:2x2x1
jax: 0.10.0
libtpu: 0.0.40
codegen_flags: <defaults>
</compile_context>

<pallas_src>
import math

import jax
import jax.numpy as jnp
from jax import lax
from jax.experimental import pallas as pl
from jax.experimental.pallas import tpu as pltpu

# ----- DiMPSteepestDescentGN hyper-parameters (module defaults, num_iter=2) -----
NUM_ITER = 2
FEAT_STRIDE = 16
INIT_STEP_LENGTH = 1.0
INIT_FILTER_REG = 0.01
INIT_GAUSS_SIGMA = 1.0
NUM_DIST_BINS = 5
BIN_DISPLACEMENT = 1.0
MASK_INIT_FACTOR = 4.0
MIN_FILTER_REG = 1e-3
ALPHA_EPS = 0.0
# TODO(synk): detach_length / autograd detach semantics have no meaning in this
# forward-only kernel (no gradient graph is built); log_step_length / filter_reg
# are treated as their (constant) initial values.

LANE = 128
SUBLANE = 8
LOSS_PAD = 128     # lane-dense loss row; first num_iter+1 columns are meaningful
LABEL_TB = 8       # samples per label-kernel grid step (sublane-aligned)


def _round_up(x, m):
    return ((x + m - 1) // m) * m


# --------------------------------------------------------------------------------
# Kernel 1: distance-map bins -> label map, target mask (sigmoid), spatial weight
#           (lane-dense: spatial flattened to lanes, LABEL_TB samples per step)
# --------------------------------------------------------------------------------
def make_label_kernel(num_bins, bin_disp):
    inv_disp = 1.0 / float(bin_disp)

    def kernel(binw_ref, yy_ref, xx_ref, center_ref, lab_ref, tm_ref, spw_ref):
        c = center_ref[...]                       # (TB, 2)
        cy = c[:, 0:1]
        cx = c[:, 1:2]
        d0 = yy_ref[...] - cy                     # (TB, HWP)
        d1 = xx_ref[...] - cx
        dist = jnp.sqrt(d0 * d0 + d1 * d1)

        lab = jnp.zeros_like(dist)
        msk = jnp.zeros_like(dist)
        spw = jnp.zeros_like(dist)
        for k in range(num_bins):
            bin_diff = dist * inv_disp - float(k)
            if k < num_bins - 1:
                bv = jnp.maximum(1.0 - jnp.abs(bin_diff), 0.0)
            else:
                bv = jnp.clip(1.0 + bin_diff, 0.0, 1.0)
            lab = lab + binw_ref[0, k] * bv
            msk = msk + binw_ref[1, k] * bv
            spw = spw + binw_ref[2, k] * bv

        lab_ref[...] = lab
        tm_ref[...] = 0.5 * (jnp.tanh(0.5 * msk) + 1.0)   # stable sigmoid (mask_act)
        spw_ref[...] = spw

    return kernel


def label_maps_pallas(center, bin_weights, h_out, w_out):
    """center: (N, 2) float32 (y, x).  Returns (label, mask_sig, spw), each (Npad, HWP)."""
    n = center.shape[0]
    hw = h_out * w_out
    hwp = _round_up(hw, LANE)
    npad = _round_up(max(n, LABEL_TB), LABEL_TB)

    center_p = jnp.zeros((npad, 2), jnp.float32).at[:n].set(center)
    idx = jnp.arange(hwp, dtype=jnp.float32)
    yy = jnp.where(idx < hw, jnp.floor(idx / w_out), 0.0).reshape(1, hwp)
    xx = jnp.where(idx < hw, jnp.mod(idx, w_out), 0.0).reshape(1, hwp)

    out_shape = tuple(jax.ShapeDtypeStruct((npad, hwp), jnp.float32) for _ in range(3))
    grid_spec = pltpu.PrefetchScalarGridSpec(
        num_scalar_prefetch=0,
        grid=(npad // LABEL_TB,),
        in_specs=[
            pl.BlockSpec(memory_space=pltpu.MemorySpace.SMEM),      # bin weights (3, NB)
            pl.BlockSpec((1, hwp), lambda g: (0, 0)),               # flat y coords
            pl.BlockSpec((1, hwp), lambda g: (0, 0)),               # flat x coords
            pl.BlockSpec((LABEL_TB, 2), lambda g: (g, 0)),          # centers (y, x)
        ],
        out_specs=tuple(
            pl.BlockSpec((LABEL_TB, hwp), lambda g: (g, 0)) for _ in range(3)),
    )
    return pl.pallas_call(
        make_label_kernel(NUM_DIST_BINS, BIN_DISPLACEMENT),
        out_shape=out_shape,
        grid_spec=grid_spec,
        compiler_params=pltpu.CompilerParams(dimension_semantics=("parallel",)),
    )(bin_weights, yy, xx, center_p)


# --------------------------------------------------------------------------------
# Kernel 2: unrolled steepest-descent Gauss-Newton filter optimization (per sequence)
# --------------------------------------------------------------------------------
def make_gn_kernel(num_iter, reg, step, alpha_eps):
    reg = float(reg)
    step = float(step)
    reg_eps = float(reg + alpha_eps)

    def kernel(p_ref, maps_ref, w0_ref, iters_ref, loss_ref):
        P = p_ref[0]                        # (Kp, IHWp)
        maps = maps_ref[0]                  # (3, IHWp): [label, target_mask, sample_w]
        lab = maps[0:1, :]
        tm = maps[1:2, :]
        sw = maps[2:3, :]
        w = w0_ref[0]                       # (1, Kp)

        iters_ref[0, 0:1, :] = w            # initial iterate

        lane = lax.broadcasted_iota(jnp.int32, (1, LOSS_PAD), 1)
        loss_vec = jnp.zeros((1, LOSS_PAD), jnp.float32)

        tm_neg = 0.5 * (1.0 - tm)
        tm_pos = 0.5 * (1.0 + tm)

        # scores = apply_filter(feat, weights); reused across iterations via
        # (w - a*g) @ P = scores - a*(g @ P) -> only 2 passes over P per iteration.
        scores = jnp.dot(w, P, preferred_element_type=jnp.float32)        # (1, IHWp)

        for it in range(num_iter):
            # LeakyReluPar / LeakyReluParDeriv with a = target_mask
            scores_act = tm_neg * jnp.abs(scores) + tm_pos * scores
            score_mask = tm_neg * jnp.sign(scores) + tm_pos
            residuals = sw * (scores_act - lab)
            loss_it = jnp.sum(residuals * residuals) + reg * jnp.sum(w * w)
            loss_vec = loss_vec + jnp.where(lane == it, loss_it, 0.0)

            residuals_mapped = score_mask * (sw * residuals)
            # weights_grad = apply_feat_transpose(feat, residuals_mapped) + reg * w
            # (contract the IHW axes directly — no materialized P^T)
            grad = lax.dot_general(
                residuals_mapped, P,
                dimension_numbers=(((1,), (1,)), ((), ())),
                preferred_element_type=jnp.float32) + reg * w             # (1, Kp)
            # scores_grad = apply_filter(feat, weights_grad)
            sgrad_raw = jnp.dot(grad, P, preferred_element_type=jnp.float32)  # (1, IHWp)
            sgrad = sw * (score_mask * sgrad_raw)

            a_num = jnp.sum(grad * grad)
            a_den = jnp.maximum(jnp.sum(sgrad * sgrad) + reg_eps * a_num, 1e-8)
            sa = step * (a_num / a_den)

            w = w - sa * grad
            scores = scores - sa * sgrad_raw        # exact update of w @ P
            iters_ref[0, it + 1:it + 2, :] = w      # final row (it == num_iter-1) is w_out

        # final loss (updated weights; scores already equals w @ P)
        scores_act = tm_neg * jnp.abs(scores) + tm_pos * scores
        residuals = sw * (scores_act - lab)
        loss_fin = jnp.sum(residuals * residuals) + reg * jnp.sum(w * w)
        loss_vec = loss_vec + jnp.where(lane == num_iter, loss_fin, 0.0)

        loss_ref[0] = loss_vec

    return kernel


def gn_pallas(P, maps, w0, num_iter, reg, step, alpha_eps):
    S, Kp, IHWp = P.shape
    out_shape = (
        jax.ShapeDtypeStruct((S, num_iter + 1, Kp), jnp.float32),   # iterates (last = final)
        jax.ShapeDtypeStruct((S, 1, LOSS_PAD), jnp.float32),        # per-seq losses
    )
    grid_spec = pltpu.PrefetchScalarGridSpec(
        num_scalar_prefetch=0,
        grid=(S,),
        in_specs=[
            pl.BlockSpec((1, Kp, IHWp), lambda s: (s, 0, 0)),     # im2col patches P
            pl.BlockSpec((1, 3, IHWp), lambda s: (s, 0, 0)),      # [label, mask, samp_w]
            pl.BlockSpec((1, 1, Kp), lambda s: (s, 0, 0)),        # init weights
        ],
        out_specs=(
            pl.BlockSpec((1, num_iter + 1, Kp), lambda s: (s, 0, 0)),
            pl.BlockSpec((1, 1, LOSS_PAD), lambda s: (s, 0, 0)),
        ),
    )
    # Per-sequence double-buffered footprint (P dominates) + headroom, capped below
    # the physical VMEM of every generation (v7x: 64 MiB).
    it_rows = max(SUBLANE, num_iter + 1)
    per_seq_words = (Kp * IHWp + SUBLANE * IHWp
                     + (SUBLANE + it_rows) * Kp + SUBLANE * LOSS_PAD)
    est = 2 * 4 * per_seq_words + (4 << 20)
    try:
        cap = int(0.75 * pltpu.get_tpu_info().vmem_capacity_bytes)
    except Exception:
        cap = 48 << 20
    vmem_limit = int(min(max(est, 16 << 20), cap))
    # TODO(synk): for very large per-sequence P (e.g. realistic DiMP sizes on v7x),
    # the IHW axis should additionally be tiled / streamed from HBM.
    return pl.pallas_call(
        make_gn_kernel(num_iter, reg, step, alpha_eps),
        out_shape=out_shape,
        grid_spec=grid_spec,
        compiler_params=pltpu.CompilerParams(
            dimension_semantics=("parallel",),
            vmem_limit_bytes=vmem_limit),
    )(P, maps, w0)


# --------------------------------------------------------------------------------
# Glue: parameter init, centers, im2col patches, padding, layout plumbing
# --------------------------------------------------------------------------------
def _prepare_inputs(weights, feat, bb):
    I, S, C, H, W = feat.shape
    _, _, fH, fW = weights.shape
    Ho = H + (fH + 1) % 2
    Wo = W + (fW + 1) % 2
    HW = Ho * Wo
    K = C * fH * fW
    IHW = I * HW
    Kp = _round_up(K, LANE)
    IHWp = _round_up(IHW, LANE)

    step_length_factor = math.exp(math.log(INIT_STEP_LENGTH))
    reg_weight = max(INIT_FILTER_REG ** 2, MIN_FILTER_REG ** 2)

    # target center (y, x) in feature-grid coordinates
    dmap_offset = jnp.array([fH % 2, fW % 2], jnp.float32) / 2.0
    c_xy = (bb[..., :2] + bb[..., 2:] / 2.0) / FEAT_STRIDE
    center = c_xy.reshape(-1, 2)[:, ::-1] - dmap_offset                 # (I*S, 2)

    # deterministic init of the learned 1x1 convs over distance bins; sqrt(1/I)
    # (sample_weight=None branch) is folded into the spatial-weight row.
    d = jnp.arange(NUM_DIST_BINS, dtype=jnp.float32) * BIN_DISPLACEMENT
    init_gauss = jnp.exp(-0.5 * (d / INIT_GAUSS_SIGMA) ** 2)
    bin_weights = jnp.stack(
        [init_gauss - init_gauss.min(),                                 # label predictor
         MASK_INIT_FACTOR * jnp.tanh(2.0 - d),                          # mask (bias 0)
         math.sqrt(1.0 / I) * jnp.ones((NUM_DIST_BINS,), jnp.float32)], axis=0)

    lab, tmask, samp_w = label_maps_pallas(center.astype(jnp.float32),
                                           bin_weights, Ho, Wo)

    def seq_major(x):        # (Npad, HWP) -> (S, I*HW), zero-padded to IHWp
        x = x[:I * S, :HW].reshape(I, S, HW).transpose(1, 0, 2).reshape(S, IHW)
        return jnp.pad(x, ((0, 0), (0, IHWp - IHW)))

    maps = jnp.stack([seq_major(lab), seq_major(tmask), seq_major(samp_w)], axis=1)

    # im2col: P[s, c*fH*fW + dy*fW + dx, i*Ho*Wo + u*Wo + v] = feat_pad[i,s,c,u+dy,v+dx]
    p0, p1 = fH // 2, fW // 2
    feat_pad = jnp.pad(feat, ((0, 0), (0, 0), (0, 0), (p0, p0), (p1, p1)))
    cols = [feat_pad[:, :, :, dy:dy + Ho, dx:dx + Wo]
            for dy in range(fH) for dx in range(fW)]
    cols = jnp.stack(cols, axis=3)                                      # (I,S,C,fHfW,Ho,Wo)
    P = cols.reshape(I, S, K, HW).transpose(1, 2, 0, 3).reshape(S, K, IHW)
    P = jnp.pad(P, ((0, 0), (0, Kp - K), (0, IHWp - IHW)))              # zero-pad: exact

    w0 = jnp.pad(weights.reshape(S, 1, K), ((0, 0), (0, 0), (0, Kp - K)))

    return dict(
        reg=reg_weight, step=step_length_factor,
        P=P, maps=maps, w0=w0,
        dims=(I, S, C, H, W, fH, fW, Ho, Wo, K, Kp, IHW, IHWp),
    )


def dimp_steepest_descent_gn(weights, feat, bb, num_iter=NUM_ITER):
    prep = _prepare_inputs(weights, feat, bb)
    I, S, C, H, W, fH, fW, Ho, Wo, K, Kp, IHW, IHWp = prep["dims"]
    iters, loss_part = gn_pallas(
        prep["P"], prep["maps"], prep["w0"], num_iter,
        prep["reg"], prep["step"], ALPHA_EPS)
    weights_final = iters[:, num_iter, :K].reshape(S, C, fH, fW)
    weight_iterates = iters[:, :, :K].transpose(1, 0, 2).reshape(
        num_iter + 1, S, C, fH, fW)
    weight_iterates = weight_iterates[-4:]        # module keeps at most last 4 iterates
    losses = loss_part[:, 0, :num_iter + 1].sum(axis=0) / S
    return weights_final, weight_iterates, losses


# --------------------------------------------------------------------------------
# Plain-JAX reference of the GN unroll (same padded im2col inputs) for a cross-check
# --------------------------------------------------------------------------------
def _gn_reference(prep, num_iter, alpha_eps):
    reg = prep["reg"]
    step = prep["step"]
    P, maps, w = prep["P"], prep["maps"], prep["w0"]
    lab = maps[:, 0:1]
    tm = maps[:, 1:2]
    sw = maps[:, 2:3]
    S = P.shape[0]

    def apply_f(wc):
        return jnp.einsum("sak,skh->sah", wc, P)

    losses = []
    for _ in range(num_iter):
        s_ = apply_f(w)
        s_act = 0.5 * (1 - tm) * jnp.abs(s_) + 0.5 * (1 + tm) * s_
        s_msk = 0.5 * (1 - tm) * jnp.sign(s_) + 0.5 * (1 + tm)
        res = sw * (s_act - lab)
        losses.append(jnp.sum(res ** 2) + reg * jnp.sum(w ** 2))
        rm = s_msk * (sw * res)
        grad = jnp.einsum("sah,skh->sak", rm, P) + reg * w
        sg = sw * (s_msk * apply_f(grad))
        a_num = jnp.sum(grad ** 2, axis=(1, 2))
        a_den = jnp.maximum(jnp.sum(sg ** 2, axis=(1, 2)) + (reg + alpha_eps) * a_num, 1e-8)
        w = w - step * (a_num / a_den)[:, None, None] * grad
    s_ = apply_f(w)
    s_act = 0.5 * (1 - tm) * jnp.abs(s_) + 0.5 * (1 + tm) * s_
    res = sw * (s_act - lab)
    losses.append(jnp.sum(res ** 2) + reg * jnp.sum(w ** 2))
    return w, jnp.stack(losses) / S


if __name__ == "__main__":
    key = jax.random.PRNGKey(0)
    k_feat, k_w, k_bb = jax.random.split(key, 3)
    I, S, C, H, W = 2, 2, 8, 16, 16
    fH = fW = 3

    feat = jax.random.normal(k_feat, (I, S, C, H, W), dtype=jnp.float32)
    weights = 0.1 * jax.random.normal(k_w, (S, C, fH, fW), dtype=jnp.float32)
    xy = jax.random.uniform(k_bb, (I, S, 2), minval=48.0, maxval=176.0, dtype=jnp.float32)
    wh = jax.random.uniform(jax.random.fold_in(k_bb, 1), (I, S, 2),
                            minval=48.0, maxval=96.0, dtype=jnp.float32)
    bb = jnp.concatenate([xy, wh], axis=-1)           # (x, y, w, h) image coords

    w_final, w_iters, losses = dimp_steepest_descent_gn(weights, feat, bb, NUM_ITER)
    jax.block_until_ready((w_final, w_iters, losses))

    # sanity cross-check of the Pallas GN kernel against plain JAX on identical inputs
    prep = _prepare_inputs(weights, feat, bb)
    w_ref, losses_ref = _gn_reference(prep, NUM_ITER, ALPHA_EPS)
    K = C * fH * fW
    w_ref = w_ref[:, 0, :K].reshape(S, C, fH, fW)
    err_w = float(jnp.max(jnp.abs(w_final - w_ref)) / (jnp.max(jnp.abs(w_ref)) + 1e-8))
    err_l = float(jnp.max(jnp.abs(losses - losses_ref)) / (jnp.max(jnp.abs(losses_ref)) + 1e-8))

    assert w_final.shape == (S, C, fH, fW)
    assert w_iters.shape == (NUM_ITER + 1, S, C, fH, fW)
    assert losses.shape == (NUM_ITER + 1,)
    assert bool(jnp.all(jnp.isfinite(w_final))) and bool(jnp.all(jnp.isfinite(losses)))
    assert err_w < 0.05 and err_l < 0.05, (err_w, err_l)
    print("KERNEL_OK")
</pallas_src>

<mosaic_0001>
module attributes {stable_mosaic.version = 11 : i64} {
  func.func @kernel(%arg0: i32, %arg1: memref<3x5xf32, #tpu.memory_space<smem>>, %arg2: memref<1x256xf32, #tpu.memory_space<vmem>>, %arg3: memref<1x256xf32, #tpu.memory_space<vmem>>, %arg4: memref<8x2xf32, #tpu.memory_space<vmem>>, %arg5: memref<8x256xf32, #tpu.memory_space<vmem>>, %arg6: memref<8x256xf32, #tpu.memory_space<vmem>>, %arg7: memref<8x256xf32, #tpu.memory_space<vmem>>) attributes {dimension_semantics = [#tpu.dimension_semantics<parallel>], iteration_bounds = array<i64: 1>, scalar_prefetch = 0 : i64, scratch_operands = 0 : i64, tpu.core_type = #tpu.core_type<tc>, window_params = [{transform_indices = @transform_0, window_bounds = array<i64: 3, 5>}, {pipeline_mode = #tpu.pipeline_mode<synchronous>, transform_indices = @transform_1, window_bounds = array<i64: 1, 256>}, {pipeline_mode = #tpu.pipeline_mode<synchronous>, transform_indices = @transform_2, window_bounds = array<i64: 1, 256>}, {transform_indices = @transform_3, window_bounds = array<i64: 8, 2>}, {transform_indices = @transform_4, window_bounds = array<i64: 8, 256>}, {transform_indices = @transform_5, window_bounds = array<i64: 8, 256>}, {transform_indices = @transform_6, window_bounds = array<i64: 8, 256>}]} {
    %c0 = arith.constant 0 : index
    %c0_0 = arith.constant 0 : index
    %0 = vector.load %arg4[%c0, %c0_0] : memref<8x2xf32, #tpu.memory_space<vmem>>, vector<8x2xf32>
    %1 = vector.extract_strided_slice %0 {offsets = [0, 0], sizes = [8, 1], strides = [1, 1]} : vector<8x2xf32> to vector<8x1xf32>
    %2 = vector.extract_strided_slice %0 {offsets = [0, 1], sizes = [8, 1], strides = [1, 1]} : vector<8x2xf32> to vector<8x1xf32>
    %c0_1 = arith.constant 0 : index
    %c0_2 = arith.constant 0 : index
    %3 = vector.load %arg2[%c0_1, %c0_2] : memref<1x256xf32, #tpu.memory_space<vmem>>, vector<1x256xf32>
    %4 = vector.broadcast %3 : vector<1x256xf32> to vector<8x256xf32>
    %5 = vector.broadcast %1 : vector<8x1xf32> to vector<8x256xf32>
    %6 = arith.subf %4, %5 : vector<8x256xf32>
    %c0_3 = arith.constant 0 : index
    %c0_4 = arith.constant 0 : index
    %7 = vector.load %arg3[%c0_3, %c0_4] : memref<1x256xf32, #tpu.memory_space<vmem>>, vector<1x256xf32>
    %8 = vector.broadcast %7 : vector<1x256xf32> to vector<8x256xf32>
    %9 = vector.broadcast %2 : vector<8x1xf32> to vector<8x256xf32>
    %10 = arith.subf %8, %9 : vector<8x256xf32>
    %11 = arith.mulf %6, %6 : vector<8x256xf32>
    %12 = arith.mulf %10, %10 : vector<8x256xf32>
    %13 = arith.addf %11, %12 : vector<8x256xf32>
    %14 = math.sqrt %13 : vector<8x256xf32>
    %cst = arith.constant 0.000000e+00 : f32
    %15 = vector.broadcast %cst : f32 to vector<8x256xf32>
    %cst_5 = arith.constant 0.000000e+00 : f32
    %16 = vector.broadcast %cst_5 : f32 to vector<8x256xf32>
    %cst_6 = arith.constant 0.000000e+00 : f32
    %17 = vector.broadcast %cst_6 : f32 to vector<8x256xf32>
    %cst_7 = arith.constant 1.000000e+00 : f32
    %18 = vector.broadcast %cst_7 : f32 to vector<8x256xf32>
    %19 = arith.mulf %14, %18 : vector<8x256xf32>
    %cst_8 = arith.constant 0.000000e+00 : f32
    %20 = vector.broadcast %cst_8 : f32 to vector<8x256xf32>
    %21 = arith.subf %19, %20 : vector<8x256xf32>
    %22 = math.absf %21 : vector<8x256xf32>
    %cst_9 = arith.constant 1.000000e+00 : f32
    %23 = vector.broadcast %cst_9 : f32 to vector<8x256xf32>
    %24 = arith.subf %23, %22 : vector<8x256xf32>
    %cst_10 = arith.constant 0.000000e+00 : f32
    %25 = vector.broadcast %cst_10 : f32 to vector<8x256xf32>
    %26 = arith.maximumf %24, %25 : vector<8x256xf32>
    %c0_11 = arith.constant 0 : index
    %c0_12 = arith.constant 0 : index
    %27 = memref.load %arg1[%c0_11, %c0_12] : memref<3x5xf32, #tpu.memory_space<smem>>
    %28 = vector.broadcast %27 : f32 to vector<8x256xf32>
    %29 = arith.mulf %28, %26 : vector<8x256xf32>
    %30 = arith.addf %15, %29 : vector<8x256xf32>
    %c1 = arith.constant 1 : index
    %c0_13 = arith.constant 0 : index
    %31 = memref.load %arg1[%c1, %c0_13] : memref<3x5xf32, #tpu.memory_space<smem>>
    %32 = vector.broadcast %31 : f32 to vector<8x256xf32>
    %33 = arith.mulf %32, %26 : vector<8x256xf32>
    %34 = arith.addf %16, %33 : vector<8x256xf32>
    %c2 = arith.constant 2 : index
    %c0_14 = arith.constant 0 : index
    %35 = memref.load %arg1[%c2, %c0_14] : memref<3x5xf32, #tpu.memory_space<smem>>
    %36 = vector.broadcast %35 : f32 to vector<8x256xf32>
    %37 = arith.mulf %36, %26 : vector<8x256xf32>
    %38 = arith.addf %17, %37 : vector<8x256xf32>
    %cst_15 = arith.constant 1.000000e+00 : f32
    %39 = vector.broadcast %cst_15 : f32 to vector<8x256xf32>
    %40 = arith.mulf %14, %39 : vector<8x256xf32>
    %cst_16 = arith.constant 1.000000e+00 : f32
    %41 = vector.broadcast %cst_16 : f32 to vector<8x256xf32>
    %42 = arith.subf %40, %41 : vector<8x256xf32>
    %43 = math.absf %42 : vector<8x256xf32>
    %cst_17 = arith.constant 1.000000e+00 : f32
    %44 = vector.broadcast %cst_17 : f32 to vector<8x256xf32>
    %45 = arith.subf %44, %43 : vector<8x256xf32>
    %cst_18 = arith.constant 0.000000e+00 : f32
    %46 = vector.broadcast %cst_18 : f32 to vector<8x256xf32>
    %47 = arith.maximumf %45, %46 : vector<8x256xf32>
    %c0_19 = arith.constant 0 : index
    %c1_20 = arith.constant 1 : index
    %48 = memref.load %arg1[%c0_19, %c1_20] : memref<3x5xf32, #tpu.memory_space<smem>>
    %49 = vector.broadcast %48 : f32 to vector<8x256xf32>
    %50 = arith.mulf %49, %47 : vector<8x256xf32>
    %51 = arith.addf %30, %50 : vector<8x256xf32>
    %c1_21 = arith.constant 1 : index
    %c1_22 = arith.constant 1 : index
    %52 = memref.load %arg1[%c1_21, %c1_22] : memref<3x5xf32, #tpu.memory_space<smem>>
    %53 = vector.broadcast %52 : f32 to vector<8x256xf32>
    %54 = arith.mulf %53, %47 : vector<8x256xf32>
    %55 = arith.addf %34, %54 : vector<8x256xf32>
    %c2_23 = arith.constant 2 : index
    %c1_24 = arith.constant 1 : index
    %56 = memref.load %arg1[%c2_23, %c1_24] : memref<3x5xf32, #tpu.memory_space<smem>>
    %57 = vector.broadcast %56 : f32 to vector<8x256xf32>
    %58 = arith.mulf %57, %47 : vector<8x256xf32>
    %59 = arith.addf %38, %58 : vector<8x256xf32>
    %cst_25 = arith.constant 1.000000e+00 : f32
    %60 = vector.broadcast %cst_25 : f32 to vector<8x256xf32>
    %61 = arith.mulf %14, %60 : vector<8x256xf32>
    %cst_26 = arith.constant 2.000000e+00 : f32
    %62 = vector.broadcast %cst_26 : f32 to vector<8x256xf32>
    %63 = arith.subf %61, %62 : vector<8x256xf32>
    %64 = math.absf %63 : vector<8x256xf32>
    %cst_27 = arith.constant 1.000000e+00 : f32
    %65 = vector.broadcast %cst_27 : f32 to vector<8x256xf32>
    %66 = arith.subf %65, %64 : vector<8x256xf32>
    %cst_28 = arith.constant 0.000000e+00 : f32
    %67 = vector.broadcast %cst_28 : f32 to vector<8x256xf32>
    %68 = arith.maximumf %66, %67 : vector<8x256xf32>
    %c0_29 = arith.constant 0 : index
    %c2_30 = arith.constant 2 : index
    %69 = memref.load %arg1[%c0_29, %c2_30] : memref<3x5xf32, #tpu.memory_space<smem>>
    %70 = vector.broadcast %69 : f32 to vector<8x256xf32>
    %71 = arith.mulf %70, %68 : vector<8x256xf32>
    %72 = arith.addf %51, %71 : vector<8x256xf32>
    %c1_31 = arith.constant 1 : index
    %c2_32 = arith.constant 2 : index
    %73 = memref.load %arg1[%c1_31, %c2_32] : memref<3x5xf32, #tpu.memory_space<smem>>
    %74 = vector.broadcast %73 : f32 to vector<8x256xf32>
    %75 = arith.mulf %74, %68 : vector<8x256xf32>
    %76 = arith.addf %55, %75 : vector<8x256xf32>
    %c2_33 = arith.constant 2 : index
    %c2_34 = arith.constant 2 : index
    %77 = memref.load %arg1[%c2_33, %c2_34] : memref<3x5xf32, #tpu.memory_space<smem>>
    %78 = vector.broadcast %77 : f32 to vector<8x256xf32>
    %79 = arith.mulf %78, %68 : vector<8x256xf32>
    %80 = arith.addf %59, %79 : vector<8x256xf32>
    %cst_35 = arith.constant 1.000000e+00 : f32
    %81 = vector.broadcast %cst_35 : f32 to vector<8x256xf32>
    %82 = arith.mulf %14, %81 : vector<8x256xf32>
    %cst_36 = arith.constant 3.000000e+00 : f32
    %83 = vector.broadcast %cst_36 : f32 to vector<8x256xf32>
    %84 = arith.subf %82, %83 : vector<8x256xf32>
    %85 = math.absf %84 : vector<8x256xf32>
    %cst_37 = arith.constant 1.000000e+00 : f32
    %86 = vector.broadcast %cst_37 : f32 to vector<8x256xf32>
    %87 = arith.subf %86, %85 : vector<8x256xf32>
    %cst_38 = arith.constant 0.000000e+00 : f32
    %88 = vector.broadcast %cst_38 : f32 to vector<8x256xf32>
    %89 = arith.maximumf %87, %88 : vector<8x256xf32>
    %c0_39 = arith.constant 0 : index
    %c3 = arith.constant 3 : index
    %90 = memref.load %arg1[%c0_39, %c3] : memref<3x5xf32, #tpu.memory_space<smem>>
    %91 = vector.broadcast %90 : f32 to vector<8x256xf32>
    %92 = arith.mulf %91, %89 : vector<8x256xf32>
    %93 = arith.addf %72, %92 : vector<8x256xf32>
    %c1_40 = arith.constant 1 : index
    %c3_41 = arith.constant 3 : index
    %94 = memref.load %arg1[%c1_40, %c3_41] : memref<3x5xf32, #tpu.memory_space<smem>>
    %95 = vector.broadcast %94 : f32 to vector<8x256xf32>
    %96 = arith.mulf %95, %89 : vector<8x256xf32>
    %97 = arith.addf %76, %96 : vector<8x256xf32>
    %c2_42 = arith.constant 2 : index
    %c3_43 = arith.constant 3 : index
    %98 = memref.load %arg1[%c2_42, %c3_43] : memref<3x5xf32, #tpu.memory_space<smem>>
    %99 = vector.broadcast %98 : f32 to vector<8x256xf32>
    %100 = arith.mulf %99, %89 : vector<8x256xf32>
    %101 = arith.addf %80, %100 : vector<8x256xf32>
    %cst_44 = arith.constant 1.000000e+00 : f32
    %102 = vector.broadcast %cst_44 : f32 to vector<8x256xf32>
    %103 = arith.mulf %14, %102 : vector<8x256xf32>
    %cst_45 = arith.constant 4.000000e+00 : f32
    %104 = vector.broadcast %cst_45 : f32 to vector<8x256xf32>
    %105 = arith.subf %103, %104 : vector<8x256xf32>
    %cst_46 = arith.constant 1.000000e+00 : f32
    %106 = vector.broadcast %cst_46 : f32 to vector<8x256xf32>
    %107 = arith.addf %106, %105 : vector<8x256xf32>
    %cst_47 = arith.constant 0.000000e+00 : f32
    %cst_48 = arith.constant 1.000000e+00 : f32
    %108 = vector.broadcast %cst_47 : f32 to vector<8x256xf32>
    %109 = arith.maximumf %108, %107 : vector<8x256xf32>
    %110 = vector.broadcast %cst_48 : f32 to vector<8x256xf32>
    %111 = arith.minimumf %110, %109 : vector<8x256xf32>
    %c0_49 = arith.constant 0 : index
    %c4 = arith.constant 4 : index
    %112 = memref.load %arg1[%c0_49, %c4] : memref<3x5xf32, #tpu.memory_space<smem>>
    %113 = vector.broadcast %112 : f32 to vector<8x256xf32>
    %114 = arith.mulf %113, %111 : vector<8x256xf32>
    %115 = arith.addf %93, %114 : vector<8x256xf32>
    %c1_50 = arith.constant 1 : index
    %c4_51 = arith.constant 4 : index
    %116 = memref.load %arg1[%c1_50, %c4_51] : memref<3x5xf32, #tpu.memory_space<smem>>
    %117 = vector.broadcast %116 : f32 to vector<8x256xf32>
    %118 = arith.mulf %117, %111 : vector<8x256xf32>
    %119 = arith.addf %97, %118 : vector<8x256xf32>
    %c2_52 = arith.constant 2 : index
    %c4_53 = arith.constant 4 : index
    %120 = memref.load %arg1[%c2_52, %c4_53] : memref<3x5xf32, #tpu.memory_space<smem>>
    %121 = vector.broadcast %120 : f32 to vector<8x256xf32>
    %122 = arith.mulf %121, %111 : vector<8x256xf32>
    %123 = arith.addf %101, %122 : vector<8x256xf32>
    %c0_54 = arith.constant 0 : index
    %c0_55 = arith.constant 0 : index
    %124 = vector.load %arg5[%c0_54, %c0_55] : memref<8x256xf32, #tpu.memory_space<vmem>>, vector<8x256xf32>
    tpu.vector_store %arg5[%c0_54, %c0_55], %115 {strides = array<i32>} : memref<8x256xf32, #tpu.memory_space<vmem>>, vector<8x256xf32>,
    %cst_56 = arith.constant 5.000000e-01 : f32
    %125 = vector.broadcast %cst_56 : f32 to vector<8x256xf32>
    %126 = arith.mulf %125, %119 : vector<8x256xf32>
    %127 = math.tanh %126 : vector<8x256xf32>
    %cst_57 = arith.constant 1.000000e+00 : f32
    %128 = vector.broadcast %cst_57 : f32 to vector<8x256xf32>
    %129 = arith.addf %127, %128 : vector<8x256xf32>
    %cst_58 = arith.constant 5.000000e-01 : f32
    %130 = vector.broadcast %cst_58 : f32 to vector<8x256xf32>
    %131 = arith.mulf %130, %129 : vector<8x256xf32>
    %c0_59 = arith.constant 0 : index
    %c0_60 = arith.constant 0 : index
    %132 = vector.load %arg6[%c0_59, %c0_60] : memref<8x256xf32, #tpu.memory_space<vmem>>, vector<8x256xf32>
    tpu.vector_store %arg6[%c0_59, %c0_60], %131 {strides = array<i32>} : memref<8x256xf32, #tpu.memory_space<vmem>>, vector<8x256xf32>,
    %c0_61 = arith.constant 0 : index
    %c0_62 = arith.constant 0 : index
    %133 = vector.load %arg7[%c0_61, %c0_62] : memref<8x256xf32, #tpu.memory_space<vmem>>, vector<8x256xf32>
    tpu.vector_store %arg7[%c0_61, %c0_62], %123 {strides = array<i32>} : memref<8x256xf32, #tpu.memory_space<vmem>>, vector<8x256xf32>,
    return
  }
  func.func @transform_0(%arg0: i32) -> (i32, i32) {
    %c0_i32 = arith.constant 0 : i32
    %c0_i32_0 = arith.constant 0 : i32
    %c0_i32_1 = arith.constant 0 : i32
    return %c0_i32, %c0_i32_0 : i32, i32
  }
  func.func @transform_1(%arg0: i32) -> (i32, i32) {
    %c0_i32 = arith.constant 0 : i32
    %c0_i32_0 = arith.constant 0 : i32
    %c0_i32_1 = arith.constant 0 : i32
    return %c0_i32, %c0_i32_0 : i32, i32
  }
  func.func @transform_2(%arg0: i32) -> (i32, i32) {
    %c0_i32 = arith.constant 0 : i32
    %c0_i32_0 = arith.constant 0 : i32
    %c0_i32_1 = arith.constant 0 : i32
    return %c0_i32, %c0_i32_0 : i32, i32
  }
  func.func @transform_3(%arg0: i32) -> (i32, i32) {
    %c0_i32 = arith.constant 0 : i32
    %c0_i32_0 = arith.constant 0 : i32
    return %arg0, %c0_i32 : i32, i32
  }
  func.func @transform_4(%arg0: i32) -> (i32, i32) {
    %c0_i32 = arith.constant 0 : i32
    %c0_i32_0 = arith.constant 0 : i32
    return %arg0, %c0_i32 : i32, i32
  }
  func.func @transform_5(%arg0: i32) -> (i32, i32) {
    %c0_i32 = arith.constant 0 : i32
    %c0_i32_0 = arith.constant 0 : i32
    return %arg0, %c0_i32 : i32, i32
  }
  func.func @transform_6(%arg0: i32) -> (i32, i32) {
    %c0_i32 = arith.constant 0 : i32
    %c0_i32_0 = arith.constant 0 : i32
    return %arg0, %c0_i32 : i32, i32
  }
}

</mosaic_0001>

<bundles_post_ra>
// kernel: tpu_custom_call.1
= control target key start
LH: loop header
LB: loop body
LE: loop exit
PB: predicated region body
PF: predicated region fallthrough
CT: control target
= control target key end

     0   :  { %12 = vsyncpa [#allocation4], 0  ;;  %s545_s0 = inlined_call_operand.vmem [shape: f32[3,5], index: 0, kind: input, shape index: {}]   ;;  %s546_s1 = inlined_call_operand.vmem [shape: f32[1,256], index: 1, kind: input, shape index: {}]   ;;  %s547_s2 = inlined_call_operand.vmem [shape: f32[1,256], index: 2, kind: input, shape index: {}]   ;;  %s548_s3 = inlined_call_operand.vmem [shape: f32[8,2], index: 3, kind: input, shape index: {}]   ;;  %s549_s4 = inlined_call_operand.hbm [shape: f32[8,256], index: 4, kind: output, shape index: {0}]   ;;  %s550_s5 = inlined_call_operand.hbm [shape: f32[8,256], index: 5, kind: output, shape index: {1}]   ;;  %s551_s6 = inlined_call_operand.hbm [shape: f32[8,256], index: 6, kind: output, shape index: {2}]  }
   0x1   :  { %13 = vsyncpa [#allocation3], 0 }
   0x2   :  { %14 = vsyncpa [#allocation7], 0  ;;  %s21_s23 = sshll.u32 %s545_s0, 4  ;;  %s22_s23 = int_to_ptr.vmem [resolvable:$true] %s21_s23 }
   0x3   :  { %s315_s24 = scalar_lea.vmem %s22_s23, 64  ;;  %p320_p1 = scmp.lt.s32.totalorder %s22_s23, %s22_s23 }
   0x4   :  { %p316_p0 = scmp.ne.s32.totalorder %s22_s23, %s315_s24  ;;  %p321_p2 = scmp.lt.s32.totalorder %s315_s24, %s315_s24 }
   0x6   :  { %p322_p3 = por %p321_p2, %p320_p1 }
   0x8   :  { %p323_p4 = pnand %p322_p3, %p316_p0 }
   0xa   :  { %326 = shalt.err (!%p323_p4)
}
   0xb   :  { %s393_s25 = smov [#allocation2]  }
   0xc   :  { %24 = dma.vmem_to_smem %s22_s23, 64, %s393_s25, [#allocation4]  }
   0xd   :  { %387 = dma.done.wait [#allocation4], 64  }
   0xe   :  { %388 = vsyncadd [#allocation4], 4294967232 }
   0xf   :  { %34 = sfence }
  0x10   :  { %v35_v0 = vld [vmem:[%s548_s3] sm:$0xff]  ;;  %v394_v1 = vmov 0   ;;  %v395_v2 = vmov 1   ;;  %v38_v3 = vlaneseq  ;;  %s446_s3 = sld [smem:[#allocation2 + $0x80]]  ;;  %s396_s19 = smov [#allocation5]  }
  0x11   :  { %305 = vset.pattern.permute.xlu0 %v394_v1  ;;  %v36_v7 = vld [vmem:[%s546_s1] sm:$0x3]  ;;  %s448_s1 = sld [smem:[#allocation2 + $0x81]]  ;;  %s241_s20 = sshll.u32 %s396_s19, 4  ;;  %s242_s20 = int_to_ptr.vmem [resolvable:$true] %s241_s20 }
  0x12   :  { %50 = vperm.xlu0 %305, %v35_v0   ;;  %v39_v4 = vshrl.u32 %v38_v3, 7  ;;  %v55_v8 = vld [vmem:[%s547_s2] sm:$0x3]  ;;  %s450_s2 = sld [smem:[#allocation2 + $0x82]]  ;;  %s327_s21 = scalar_lea.vmem %s242_s20, 256 }
  0x13   :  { %s452_s7 = sld [smem:[#allocation2 + $0x83]]  ;;  %p328_p5 = scmp.ne.s32.totalorder %s242_s20, %s327_s21 }
  0x14   :  { %v40_v5 = vsub.s32 0, %v39_v4  ;;  %v44_v6 = vsub.s32 1, %v39_v4  ;;  %s454_s8 = sld [smem:[#allocation2]]  ;;  %p332_p6 = scmp.lt.s32.totalorder %s242_s20, %s242_s20 }
  0x15   :  { %s456_s9 = sld [smem:[#allocation2 + $0x100]]  ;;  %p333_p7 = scmp.lt.s32.totalorder %s327_s21, %s327_s21 }
  0x16   :  { %306 = vset.pattern.permute.xlu0 %v395_v2  ;;  %v41_v9 = vrot.slane %v36_v7, %v40_v5  ;;  %v45_v10 = vrot.slane %v36_v7, %v44_v6  ;;  %v60_v12 = vrot.slane %v55_v8, %v40_v5  ;;  %v64_v13 = vrot.slane %v55_v8, %v44_v6  ;;  %s458_s10 = sld [smem:[#allocation2 + $0x84]] }
  0x17   :  { %68 = vperm.xlu0 %306, %v35_v0   ;;  %s460_s11 = sld [smem:[#allocation2 + $0x1]]  ;;  %v106_v25 = vstv %s446_s3  ;;  %v132_v26 = vstv %s448_s1  ;;  %p334_p8 = por %p333_p7, %p332_p6 }
  0x18   :  { %s462_s12 = sld [smem:[#allocation2 + $0x2]]  ;;  %v158_v27 = vstv %s450_s2 }
  0x19   :  { %s464_s13 = sld [smem:[#allocation2 + $0x3]]  ;;  %v184_v28 = vstv %s452_s7  ;;  %p335_p9 = pnand %p334_p8, %p328_p5 }
  0x1a   :  { %s466_s14 = sld [smem:[#allocation2 + $0x4]]  ;;  %v100_v31 = vstv %s454_s8 }
  0x1b   :  { %s468_s15 = sld [smem:[#allocation2 + $0x101]]  ;;  %v112_v33 = vstv %s456_s9 }
  0x1c   :  { %s470_s16 = sld [smem:[#allocation2 + $0x102]]  ;;  %v210_v30 = vstv %s458_s10 }
  0x1d   :  { %v126_v32 = vstv %s460_s11  ;;  %s485_s17 = sld [smem:[#allocation2 + $0x103]] }
  0x1e   :  { %v152_v36 = vstv %s462_s12  ;;  %s506_s18 = sld [smem:[#allocation2 + $0x104]] }
  0x1f   :  { %v178_v37 = vstv %s464_s13 }
  0x20   :  { %v204_v38 = vstv %s466_s14 }
  0x21   :  { %v138_v41 = vstv %s468_s15 }
  0x22   :  { %v164_v46 = vstv %s470_s16 }
  0x8d   :  { %v51_v11 = vpop.permute.xlu0 %50 }
  0x8e   :  { %v53_v14 = vsub.f32 %v41_v9, %v51_v11  ;;  %v54_v15 = vsub.f32 %v45_v10, %v51_v11 }
  0x90   :  { %v73_v19 = vmul.f32 %v53_v14, %v53_v14  ;;  %v74_v20 = vmul.f32 %v54_v15, %v54_v15 }
  0x92   :  { %v69_v16 = vpop.permute.xlu0 %68 }
  0x93   :  { %v71_v17 = vsub.f32 %v60_v12, %v69_v16  ;;  %v72_v18 = vsub.f32 %v64_v13, %v69_v16 }
  0x95   :  { %v75_v21 = vmul.f32 %v71_v17, %v71_v17  ;;  %v76_v22 = vmul.f32 %v72_v18, %v72_v18 }
  0x97   :  { %v77_v23 = vadd.f32 %v75_v21, %v73_v19  ;;  %v78_v24 = vadd.f32 %v76_v22, %v74_v20 }
  0x99   :  { %307 = vrsqrt.f32 %v77_v23  ;;  %vm81_vm0 = vcmp.eq.f32.partialorder %v77_v23, inf  ;;  %v84_v39 = vand.u32 2147483648, %v77_v23  ;;  %vm83_vm1 = vcmp.eq.f32.partialorder %v77_v23, 0.0 }
  0x9a   :  { %309 = vrsqrt.f32 %v78_v24  ;;  %vm88_vm2 = vcmp.eq.f32.partialorder %v78_v24, inf  ;;  %v91_v43 = vand.u32 2147483648, %v78_v24  ;;  %vm90_vm3 = vcmp.eq.f32.partialorder %v78_v24, 0.0 }
  0xa6   :  { %v308_v29 = vpop.eup %307 }
  0xa7   :  { %v310_v34 = vpop.eup %309  ;;  %v80_v35 = vmul.f32 %v308_v29, %v77_v23 }
  0xa8   :  { %v87_v40 = vmul.f32 %v310_v34, %v78_v24 }
  0xa9   :  { %v82_v42 = vsel %vm81_vm0, %v77_v23, %v80_v35 }
  0xaa   :  { %v89_v44 = vsel %vm88_vm2, %v78_v24, %v87_v40  ;;  %v85_v45 = vsel %vm83_vm1, %v84_v39, %v82_v42 }
  0xab   :  { %v92_v47 = vsel %vm90_vm3, %v91_v43, %v89_v44  ;;  %v93_v48 = vand.u32 2147483647, %v85_v45  ;;  %v279_v49 = vadd.f32 -1.0, %v85_v45  ;;  %v284_v50 = vadd.f32 -2.0, %v85_v45 }
  0xac   :  { %v94_v51 = vand.u32 2147483647, %v92_v47  ;;  %v280_v52 = vadd.f32 -1.0, %v92_v47  ;;  %v285_v53 = vadd.f32 -2.0, %v92_v47  ;;  %v289_v54 = vadd.f32 -3.0, %v85_v45 }
  0xad   :  { %v95_v55 = vsub.f32 1.0, %v93_v48  ;;  %v119_v56 = vand.u32 2147483647, %v279_v49  ;;  %v145_v57 = vand.u32 2147483647, %v284_v50  ;;  %v290_v58 = vadd.f32 -3.0, %v92_v47 }
  0xae   :  { %v96_v59 = vsub.f32 1.0, %v94_v51  ;;  %v120_v60 = vand.u32 2147483647, %v280_v52  ;;  %v146_v61 = vand.u32 2147483647, %v285_v53  ;;  %v294_v62 = vadd.f32 -4.0, %v85_v45 }
  0xaf   :  { %v97_v63 = vmax.f32 %v95_v55, 0.0  ;;  %v121_v0 = vsub.f32 1.0, %v119_v56  ;;  %v147_v1 = vsub.f32 1.0, %v145_v57  ;;  %v171_v2 = vand.u32 2147483647, %v289_v54 }
  0xb0   :  { %v98_v3 = vmax.f32 %v96_v59, 0.0  ;;  %v122_v4 = vsub.f32 1.0, %v120_v60  ;;  %v148_v5 = vsub.f32 1.0, %v146_v61  ;;  %v172_v6 = vand.u32 2147483647, %v290_v58 }
  0xb1   :  { %v107_v7 = vmul.f32 %v106_v25, %v97_v63  ;;  %v123_v8 = vmax.f32 %v121_v0, 0.0  ;;  %v149_v9 = vmax.f32 %v147_v1, 0.0  ;;  %v173_v10 = vsub.f32 1.0, %v171_v2 }
  0xb2   :  { %v108_v11 = vmul.f32 %v106_v25, %v98_v3  ;;  %v124_v12 = vmax.f32 %v122_v4, 0.0  ;;  %v150_v13 = vmax.f32 %v148_v5, 0.0  ;;  %v174_v14 = vsub.f32 1.0, %v172_v6 }
  0xb3   :  { %v133_v15 = vmul.f32 %v132_v26, %v123_v8  ;;  %v159_v16 = vmul.f32 %v158_v27, %v149_v9  ;;  %v175_v17 = vmax.f32 %v173_v10, 0.0  ;;  %v295_v18 = vadd.f32 -4.0, %v92_v47 }
  0xb4   :  { %v134_v19 = vmul.f32 %v132_v26, %v124_v12  ;;  %v160_v20 = vmul.f32 %v158_v27, %v150_v13  ;;  %v487_v21 = vmax.f32 %v174_v14, 0.0  ;;  %v197_v22 = vadd.f32 1.0, %v294_v62 }
  0xb5   :  { %v135_v23 = vadd.f32 %v133_v15, %v107_v7  ;;  %v185_v24 = vmul.f32 %v184_v28, %v175_v17  ;;  %v198_v25 = vadd.f32 1.0, %v295_v18  ;;  %v101_v29 = vmul.f32 %v100_v31, %v97_v63 }
  0xb6   :  { %v136_v34 = vadd.f32 %v134_v19, %v108_v11  ;;  %v186_v35 = vmul.f32 %v184_v28, %v487_v21  ;;  %v199_v39 = vmax.f32 %v197_v22, 0.0  ;;  %v102_v26 = vmul.f32 %v100_v31, %v98_v3 }
  0xb7   :  { %v161_v27 = vadd.f32 %v159_v16, %v135_v23  ;;  %v200_v40 = vmax.f32 %v198_v25, 0.0  ;;  %v127_v42 = vmul.f32 %v126_v32, %v123_v8  ;;  %v128_v43 = vmul.f32 %v126_v32, %v124_v12 }
  0xb8   :  { %v162_v44 = vadd.f32 %v160_v20, %v136_v34  ;;  %v201_v45 = vmin.f32 %v199_v39, 1.0  ;;  %v153_v47 = vmul.f32 %v152_v36, %v149_v9  ;;  %v154_v28 = vmul.f32 %v152_v36, %v150_v13 }
  0xb9   :  { %v187_v31 = vadd.f32 %v185_v24, %v161_v27  ;;  %v202_v48 = vmin.f32 %v200_v40, 1.0  ;;  %v129_v49 = vadd.f32 %v127_v42, %v101_v29  ;;  %v130_v50 = vadd.f32 %v128_v43, %v102_v26 }
  0xba   :  { %v188_v51 = vadd.f32 %v186_v35, %v162_v44  ;;  %v211_v52 = vmul.f32 %v210_v30, %v201_v45  ;;  %v179_v32 = vmul.f32 %v178_v37, %v175_v17  ;;  %v190_v53 = vstv %s485_s17 }
  0xbb   :  { %v212_v54 = vmul.f32 %v210_v30, %v202_v48  ;;  %v155_v36 = vadd.f32 %v153_v47, %v129_v49  ;;  %v156_v55 = vadd.f32 %v154_v28, %v130_v50  ;;  %v180_v56 = vmul.f32 %v178_v37, %v487_v21 }
  0xbc   :  { %v213_v57 = vadd.f32 %v211_v52, %v187_v31  ;;  %v205_v58 = vmul.f32 %v204_v38, %v201_v45  ;;  %v206_v59 = vmul.f32 %v204_v38, %v202_v48  ;;  %v113_v60 = vmul.f32 %v112_v33, %v97_v63 }
  0xbd   :  { %v214_v61 = vadd.f32 %v212_v54, %v188_v51  ;;  %v181_v30 = vadd.f32 %v179_v32, %v155_v36  ;;  %v182_v62 = vadd.f32 %v180_v56, %v156_v55  ;;  %v139_v0 = vmul.f32 %v138_v41, %v123_v8 }
  0xbe   :  { %v223_v1 = vmul.f32 0.5, %v213_v57  ;;  %v114_v2 = vmul.f32 %v112_v33, %v98_v3  ;;  %v140_v37 = vmul.f32 %v138_v41, %v124_v12  ;;  %v165_v4 = vmul.f32 %v164_v46, %v149_v9 }
  0xbf   :  { %v224_v5 = vmul.f32 0.5, %v214_v61  ;;  %v207_v38 = vadd.f32 %v205_v58, %v181_v30  ;;  %v208_v6 = vadd.f32 %v206_v59, %v182_v62  ;;  %v141_v7 = vadd.f32 %v139_v0, %v113_v60 }
  0xc0   :  { %311 = vtanh.f32 %v223_v1  ;;  %v142_v63 = vadd.f32 %v140_v37, %v114_v2  ;;  %v166_v10 = vmul.f32 %v164_v46, %v150_v13  ;;  %v216_v11 = vstv %s506_s18 }
  0xc1   :  { %313 = vtanh.f32 %v224_v5  ;;  %221 = vst [vmem:[#allocation5] sm:$0xff] %v207_v38  ;;  %222 = vst [vmem:[#allocation5 + $0x8] sm:$0xff] %v208_v6  ;;  %v167_v8 = vadd.f32 %v165_v4, %v141_v7  ;;  %v191_v14 = vmul.f32 %v190_v53, %v175_v17 }
  0xc2   :  { %338 = shalt.err (!%p335_p9)
}
  0xc3   :  { %244 = dma.vmem_to_hbm [thread:$0]  %s242_s20, 256, %s549_s4, [#allocation3]   ;;  %v168_v33 = vadd.f32 %v166_v10, %v142_v63  ;;  %v192_v41 = vmul.f32 %v190_v53, %v487_v21  ;;  %v193_v46 = vadd.f32 %v191_v14, %v167_v8  ;;  %v217_v3 = vmul.f32 %v216_v11, %v201_v45 }
  0xc4   :  { %v218_v12 = vmul.f32 %v216_v11, %v202_v48  ;;  %s397_s24 = smov [#allocation6]   ;;  %s398_s26 = smov [#allocation8]  }
  0xc5   :  { %v194_v9 = vadd.f32 %v192_v41, %v168_v33  ;;  %v219_v13 = vadd.f32 %v217_v3, %v193_v46  ;;  %s251_s25 = sshll.u32 %s397_s24, 4  ;;  %s261_s27 = sshll.u32 %s398_s26, 4  ;;  %s252_s25 = int_to_ptr.vmem [resolvable:$true] %s251_s25  ;;  %s262_s27 = int_to_ptr.vmem [resolvable:$true] %s261_s27 }
  0xc6   :  { %s347_s4 = scalar_lea.vmem %s252_s25, 256  ;;  %p352_p11 = scmp.lt.s32.totalorder %s252_s25, %s252_s25 }
  0xc7   :  { %v220_v15 = vadd.f32 %v218_v12, %v194_v9  ;;  %233 = vst [vmem:[#allocation8] sm:$0xff] %v219_v13  ;;  %p348_p10 = scmp.ne.s32.totalorder %s252_s25, %s347_s4  ;;  %p353_p12 = scmp.lt.s32.totalorder %s347_s4, %s347_s4 }
  0xc9   :  { %234 = vst [vmem:[#allocation8 + $0x8] sm:$0xff] %v220_v15  ;;  %p354_p13 = por %p353_p12, %p352_p11 }
  0xcb   :  { %p355_p0 = pnand %p354_p13, %p348_p10 }
  0xcd   :  { %v312_v16 = vpop.eup %311 }
  0xce   :  { %v314_v17 = vpop.eup %313  ;;  %v227_v18 = vadd.f32 1.0, %v312_v16 }
  0xcf   :  { %v228_v19 = vadd.f32 1.0, %v314_v17 }
  0xd0   :  { %v229_v20 = vmul.f32 0.5, %v227_v18 }
  0xd1   :  { %v230_v22 = vmul.f32 0.5, %v228_v19 }
  0xd2   :  { %231 = vst [vmem:[#allocation6] sm:$0xff] %v229_v20 }
  0xd3   :  { %232 = vst [vmem:[#allocation6 + $0x8] sm:$0xff] %v230_v22 }
  0xd4   :  { %358 = shalt.err (!%p355_p0)
}
  0xd5   :  { %254 = dma.vmem_to_hbm [thread:$0]  %s252_s25, 256, %s550_s5, [#allocation7]  }
  0xd6   :  { %s367_s29 = scalar_lea.vmem %s262_s27, 256  ;;  %p372_p2 = scmp.lt.s32.totalorder %s262_s27, %s262_s27 }
  0xd7   :  { %p368_p1 = scmp.ne.s32.totalorder %s262_s27, %s367_s29  ;;  %p373_p3 = scmp.lt.s32.totalorder %s367_s29, %s367_s29 }
  0xd9   :  { %p374_p4 = por %p373_p3, %p372_p2 }
  0xdb   :  { %p375_p5 = pnand %p374_p4, %p368_p1 }
  0xdd   :  { %378 = shalt.err (!%p375_p5)
}
  0xde   :  { %264 = dma.vmem_to_hbm [thread:$0]  %s262_s27, 256, %s551_s6, [#allocation7]  }
  0xdf   :  { %389 = dma.done.wait [#allocation3], 256  }
  0xe0   :  { %390 = vsyncadd [#allocation3], 4294967040 }
  0xe1   :  { %391 = dma.done.wait [#allocation7], 512  }
  0xe2   :  { %392 = vsyncadd [#allocation7], 4294966784 }
  0xe3   :  { %274 = vsyncpa [#allocation3], 1 }
  0xe4   :  { %275 = vsyncpa [#allocation7], 1 }
  0xe5   :  { %276 = vsyncpa [#allocation4], 1 }

</bundles_post_ra>
